<compile_context>
chip_gen: v6e
topology: v6e:2x2x1
jax: 0.10.0
libtpu: 0.0.40
codegen_flags: <defaults>
</compile_context>

<pallas_src>
import math

import jax
import jax.numpy as jnp
from jax.experimental import pallas as pl
from jax.experimental.pallas import tpu as pltpu

_LANE = 128


def _cdiv(a, b):
    return (a + b - 1) // b


def _vmem_limit_bytes():
    """Generation-gated VMEM limit: 32 MiB on v7x (64 MiB physical), 64 MiB on v5e/v6e."""
    cap = None
    try:
        cap = getattr(pltpu.get_tpu_info(), "vmem_capacity_bytes", None)
    except Exception:
        cap = None
    if not cap:
        cap = 128 << 20
    return max(32 << 20, min(64 << 20, cap // 2))


# ----------------------------------------------------------------------------
# Kernels
# ----------------------------------------------------------------------------

def _add_pe_cols_kernel(x_ref, pe_ref, o_ref):
    """x_ref: [B, tc], pe_ref: [1, tc] -> o_ref = x + pe (broadcast over rows)."""
    o_ref[...] = (x_ref[...] + pe_ref[...]).astype(o_ref.dtype)


def _add_pe_rows_kernel(x_ref, pe_ref, o_ref):
    """x_ref: [1, ts, D], pe_ref: [ts, D] -> o_ref = x + pe (broadcast over batch)."""
    o_ref[...] = (x_ref[...] + pe_ref[...]).astype(o_ref.dtype)


# ----------------------------------------------------------------------------
# Tile selection
# ----------------------------------------------------------------------------

def _pick_col_tile(n_cols, n_rows, dtype_bytes, vmem_limit_bytes):
    """Largest 128-aligned column tile fitting 0.75*vmem_limit, capped at ~half the
    extent so the parallel grid has >= 2 steps.  Prefers an exact divisor of n_cols
    (avoids the masked partial last tile) when one exists close below the cap."""
    budget = int(0.75 * vmem_limit_bytes)
    # double-buffered x-in and out blocks (n_rows x tc) + double-buffered pe block (1 x tc)
    per_lane = 2 * (2 * n_rows + 1) * dtype_bytes
    budget_cap = max(_LANE, (budget // per_lane) // _LANE * _LANE)
    full_cap = _cdiv(n_cols, _LANE) * _LANE
    half_cap = _cdiv(_cdiv(n_cols, 2), _LANE) * _LANE      # >= 2 grid steps when possible
    tc = min(budget_cap, half_cap if n_cols > _LANE else full_cap)
    if n_cols % tc:
        cand, steps = tc - _LANE, 0
        while cand >= max(_LANE, tc // 2) and steps < 256:
            if n_cols % cand == 0:
                return cand
            cand -= _LANE
            steps += 1
    return tc


def _pick_row_tile(S, D, dtype_bytes, vmem_limit_bytes):
    """Row (sequence) tile for the 3-D path: multiple of the sublane packing, fits the
    VMEM budget, >= 2 S-steps when S allows, never overhangs the array on block 0."""
    sub = max(8, 32 // dtype_bytes)                         # 8 f32, 16 bf16, 32 int8
    budget = int(0.75 * vmem_limit_bytes)
    per_row = 2 * 3 * D * dtype_bytes                       # dbl-buffered x-in/out + pe
    ts = max(sub, (budget // per_row) // sub * sub)
    if S >= 2 * sub:
        ts = min(ts, _cdiv(_cdiv(S, 2), sub) * sub)
    ts = min(ts, max(sub, (S // sub) * sub))
    return ts


# ----------------------------------------------------------------------------
# pallas_call wrappers
# ----------------------------------------------------------------------------

def _add_pe_flat(x, pe_flat, vmem_limit):
    """Path A: lane-dense flattened broadcast add.  x:[B,S,D], pe_flat:[1, L*D]."""
    B, S, D = x.shape
    n_cols = S * D
    db = jnp.dtype(x.dtype).itemsize
    x2d = x.reshape(B, n_cols)

    if n_cols <= _LANE:
        # Tiny input: one full-extent block (block dims == array dims is always legal).
        tc = n_cols
        pe_in = jax.lax.slice(pe_flat, (0, 0), (1, n_cols))
    else:
        tc = _pick_col_tile(n_cols, B, db, vmem_limit)
        pe_in = pe_flat                                     # BlockSpec reads only needed tiles

    grid = (_cdiv(n_cols, tc),)                             # partial last tile is masked

    out2d = pl.pallas_call(
        _add_pe_cols_kernel,
        out_shape=jax.ShapeDtypeStruct((B, n_cols), x.dtype),
        grid_spec=pltpu.PrefetchScalarGridSpec(
            num_scalar_prefetch=0,
            grid=grid,
            in_specs=[
                pl.BlockSpec((B, tc), lambda c: (0, c)),    # x tile
                pl.BlockSpec((1, tc), lambda c: (0, c)),    # PE row tile
            ],
            out_specs=pl.BlockSpec((B, tc), lambda c: (0, c)),
        ),
        compiler_params=pltpu.CompilerParams(
            dimension_semantics=("parallel",),
            vmem_limit_bytes=vmem_limit,
        ),
        input_output_aliases={0: 0},
        cost_estimate=pl.CostEstimate(
            flops=B * n_cols,
            transcendentals=0,
            bytes_accessed=(2 * B + 1) * n_cols * db,
        ),
    )(x2d, pe_in)

    return out2d.reshape(B, S, D)


def _add_pe_rows(x, pe2d, vmem_limit):
    """Path B: 3-D row-tiled add for small batch + 128-aligned D.
    x:[B,S,D], pe2d:[L,D].  Grid (S_tiles, B) with B innermost; the PE BlockSpec
    ignores B, so its block stays resident across batch revisits."""
    B, S, D = x.shape
    db = jnp.dtype(x.dtype).itemsize
    ts = _pick_row_tile(S, D, db, vmem_limit)
    grid = (_cdiv(S, ts), B)

    out = pl.pallas_call(
        _add_pe_rows_kernel,
        out_shape=jax.ShapeDtypeStruct((B, S, D), x.dtype),
        grid_spec=pltpu.PrefetchScalarGridSpec(
            num_scalar_prefetch=0,
            grid=grid,
            in_specs=[
                pl.BlockSpec((1, ts, D), lambda si, bi: (bi, si, 0)),   # x tile
                pl.BlockSpec((ts, D), lambda si, bi: (si, 0)),          # PE tile (ignores bi)
            ],
            out_specs=pl.BlockSpec((1, ts, D), lambda si, bi: (bi, si, 0)),
        ),
        compiler_params=pltpu.CompilerParams(
            dimension_semantics=("parallel", "parallel"),
            vmem_limit_bytes=vmem_limit,
        ),
        input_output_aliases={0: 0},
        cost_estimate=pl.CostEstimate(
            flops=B * S * D,
            transcendentals=0,
            bytes_accessed=(2 * B + 1) * S * D * db,
        ),
    )(x, pe2d)

    return out


# ----------------------------------------------------------------------------
# Module wrapper (register_buffer analogue)
# ----------------------------------------------------------------------------

class PositionalEncodingPallas:
    def __init__(self, d_model: int, max_seq_length: int = 32768):
        assert d_model % 2 == 0, "d_model must be even (matches the PyTorch module)"
        self.d_model = d_model
        self.max_seq_length = max_seq_length

        position = jnp.arange(max_seq_length, dtype=jnp.float32)[:, None]        # [L, 1]
        div_term = jnp.exp(
            jnp.arange(0, d_model, 2, dtype=jnp.float32) * (-math.log(10000.0) / d_model)
        )                                                                          # [D/2]
        angles = position * div_term[None, :]                                      # [L, D/2]
        # Interleave: pe[:, 0::2] = sin, pe[:, 1::2] = cos
        pe = jnp.stack([jnp.sin(angles), jnp.cos(angles)], axis=-1)                # [L, D/2, 2]
        self.pe = pe.reshape(max_seq_length, d_model)                              # canonical f32 [L, D]
        self._cache = {}                                                           # (layout, dtype) -> array

    def _pe_variant(self, layout, dtype):
        key = (layout, jnp.dtype(dtype))
        if key not in self._cache:
            pe = self.pe.astype(dtype)
            if layout == "flat":
                # Row-major flatten: first S*D entries are exactly pe[:S].ravel()
                pe = pe.reshape(1, self.max_seq_length * self.d_model)
            self._cache[key] = pe
        return self._cache[key]

    def __call__(self, x):
        # x: [B, S, D] with S <= max_seq_length
        B, S, D = x.shape
        assert D == self.d_model and S <= self.max_seq_length
        db = jnp.dtype(x.dtype).itemsize
        sub = max(8, 32 // db)
        vmem_limit = _vmem_limit_bytes()

        if B < sub and D % _LANE == 0 and S >= sub:
            # Small batch: row tiling keeps sublanes dense and the lane axis = D dense.
            return _add_pe_rows(x, self._pe_variant("2d", x.dtype), vmem_limit)
        # Default: flatten to a lane-dense [B, S*D] layout.
        return _add_pe_flat(x, self._pe_variant("flat", x.dtype), vmem_limit)


# ----------------------------------------------------------------------------
# Main
# ----------------------------------------------------------------------------

if __name__ == "__main__":
    key = jax.random.PRNGKey(0)
    k1, k2 = jax.random.split(key)

    # Path A (flattened lane-dense): D not 128-aligned.
    B1, S1, D1 = 2, 8, 32
    mod1 = PositionalEncodingPallas(d_model=D1, max_seq_length=4096)
    x1 = jax.random.normal(k1, (B1, S1, D1), dtype=jnp.float32)
    ref1 = x1 + mod1.pe[None, :S1, :]
    out1 = jax.block_until_ready(mod1(x1))
    assert out1.shape == (B1, S1, D1)
    assert jnp.allclose(out1, ref1, atol=1e-6, rtol=1e-6), "Path A mismatch vs reference"

    # Path B (3-D row-tiled): small batch, 128-aligned d_model.
    B2, S2, D2 = 2, 16, 128
    mod2 = PositionalEncodingPallas(d_model=D2, max_seq_length=4096)
    x2 = jax.random.normal(k2, (B2, S2, D2), dtype=jnp.float32)
    ref2 = x2 + mod2.pe[None, :S2, :]
    out2 = jax.block_until_ready(mod2(x2))
    assert out2.shape == (B2, S2, D2)
    assert jnp.allclose(out2, ref2, atol=1e-6, rtol=1e-6), "Path B mismatch vs reference"

    print("KERNEL_OK")
</pallas_src>

<mosaic_0001>
module attributes {stable_mosaic.version = 11 : i64} {
  func.func @_add_pe_cols_kernel(%arg0: i32, %arg1: memref<2x128xf32, #tpu.memory_space<vmem>>, %arg2: memref<1x128xf32, #tpu.memory_space<vmem>>, %arg3: memref<2x128xf32, #tpu.memory_space<vmem>>) attributes {dimension_semantics = [#tpu.dimension_semantics<parallel>], iteration_bounds = array<i64: 2>, scalar_prefetch = 0 : i64, scratch_operands = 0 : i64, tpu.core_type = #tpu.core_type<tc>, window_params = [{transform_indices = @transform_0, window_bounds = array<i64: 2, 128>}, {transform_indices = @transform_1, window_bounds = array<i64: 1, 128>}, {transform_indices = @transform_2, window_bounds = array<i64: 2, 128>}]} {
    %c0 = arith.constant 0 : index
    %c0_0 = arith.constant 0 : index
    %0 = vector.load %arg1[%c0, %c0_0] : memref<2x128xf32, #tpu.memory_space<vmem>>, vector<2x128xf32>
    %c0_1 = arith.constant 0 : index
    %c0_2 = arith.constant 0 : index
    %1 = vector.load %arg2[%c0_1, %c0_2] : memref<1x128xf32, #tpu.memory_space<vmem>>, vector<1x128xf32>
    %2 = vector.broadcast %1 : vector<1x128xf32> to vector<2x128xf32>
    %3 = arith.addf %0, %2 : vector<2x128xf32>
    %c0_3 = arith.constant 0 : index
    %c0_4 = arith.constant 0 : index
    %4 = vector.load %arg3[%c0_3, %c0_4] : memref<2x128xf32, #tpu.memory_space<vmem>>, vector<2x128xf32>
    tpu.vector_store %arg3[%c0_3, %c0_4], %3 {strides = array<i32>} : memref<2x128xf32, #tpu.memory_space<vmem>>, vector<2x128xf32>,
    return
  }
  func.func @transform_0(%arg0: i32) -> (i32, i32) {
    %c0_i32 = arith.constant 0 : i32
    %c0_i32_0 = arith.constant 0 : i32
    return %c0_i32, %arg0 : i32, i32
  }
  func.func @transform_1(%arg0: i32) -> (i32, i32) {
    %c0_i32 = arith.constant 0 : i32
    %c0_i32_0 = arith.constant 0 : i32
    return %c0_i32, %arg0 : i32, i32
  }
  func.func @transform_2(%arg0: i32) -> (i32, i32) {
    %c0_i32 = arith.constant 0 : i32
    %c0_i32_0 = arith.constant 0 : i32
    return %c0_i32, %arg0 : i32, i32
  }
}

</mosaic_0001>

<bundles_post_ra>
// kernel: tpu_custom_call.1
= control target key start
LH: loop header
LB: loop body
LE: loop exit
PB: predicated region body
PF: predicated region fallthrough
CT: control target
= control target key end

     0   :  { %7 = vsyncpa [#allocation3], 0  ;;  %s705_s0 = inlined_call_operand.hbm [shape: f32[2,256], index: 0, kind: input, shape index: {}, may-alias: {0,2}]   ;;  %s706_s1 = inlined_call_operand.hbm [shape: f32[1,131072], index: 1, kind: input, shape index: {}]   ;;  %s707_s2 = inlined_call_operand.hbm [shape: f32[2,256], index: 2, kind: output, shape index: {}, may-alias: {0,2}]  }
   0x1   :  { %9 = vsyncpa [#allocation3 + $0x1], 0 }
   0x2   :  { %10 = vsyncpa [#allocation6], 0 }
   0x3   :  { %12 = vsyncpa [#allocation6 + $0x1], 0 }
   0x4   :  { %13 = vsyncpa [#allocation4], 0 }
   0x5   :  { %15 = vsyncpa [#allocation4 + $0x1], 0  ;;  %s516_s9 = smov 0   ;;  %s518_s10 = smov 0  }
   0x6   :  { %s520_s11 = smov 0   ;;  %s522_s12 = smov 0  }
   0x7 LB: > { %s537_s13 = sadd.s32 4294967295, %s496_s12   ;;  %s307_s14 = sadd.s32 4294967294, %s496_s12   ;;  %s496_s12 = sphi %s522_s12, %s726_s12   ;;  %s492_s11 = sphi %s520_s11, %s725_s11   ;;  %s488_s10 = sphi %s518_s10, %s724_s10   ;;  %s484_s9 = sphi %s516_s9, %s723_s9  }
   0x8   : > { %s541_s15 = sadd.s32 1, %s496_s12   ;;  %s28_s16 = sadd.s32 1, %s492_s11 }
   0x9   : > { %s25_s17 = ssub.s32 %s496_s12, %s541_s15  ;;  %p35_p0 = scmp.ne.s32.totalorder %s492_s11, %s488_s10 }
   0xa   : > { %p26_p1 = scmp.eq.s32.totalorder %s25_s17, 0  ;;  %p36_p2 = scmp.eq.s32.totalorder %s496_s12, 0 }
   0xb   : > { %p41_p3 = scmp.ne.s32.totalorder %s488_s10, %s484_s9  ;;  %p42_p4 = scmp.eq.s32.totalorder %s537_s13, 0 }
   0xc   : > { %s553_s18 = scalar_select %p26_p1, %s492_s11, %s28_s16  }
   0xd   : > { %p555_p5 = por %p36_p2, %p35_p0  ;;  %p559_p6 = por %p42_p4, %p41_p3 }
   0xe   : > { %p91_p7 = scmp.eq.s32.totalorder %s537_s13, 1  ;;  %p97_p8 = scmp.eq.s32.totalorder %s307_s14, 1 }
   0xf   : > { %s711_s20 = scalar_select %p559_p6, 1, 0 }
  0x10   : > { %p338_p10 = scmp.lt.s32.totalorder %s496_s12, 2  ;;  %p566_p11 = por %p91_p7, %p35_p0 }
  0x11   : > { %p570_p12 = por %p97_p8, %p41_p3  ;;  %s575_s23 = sand.u32 1, %s492_s11  }
  0x12   : > { %s712_s21 = scalar_select %p566_p11, 1, 0 }
  0x13   : > { %s713_s22 = scalar_select %p570_p12, 1, 0 }
  0x14   : > { %s311_s24 = sshll.u32 %s496_s12, 5  ;;  %s310_s25 = sshll.u32 %s575_s23, 1 }
  0x15   : > { %s582_s28 = scalar_lea.hbm %s705_s0, %s311_s24  ;;  %s121_s29 = scalar_lea.vmem [#allocation2], %s310_s25 }
  0x16   : > { %s128_s30 = sshll.u32 %s121_s29, 4  ;;  %p586_p13 = pnand %p338_p10, %p555_p5  ;;  %s590_s30 = int_to_ptr.vmem [resolvable:$true] %s128_s30 }
  0x17   : > { %s118_s4 = scalar_lea.sflag [#allocation3], %s575_s23  ;;  %s372_s5 = scalar_lea.hbm %s582_s28, 32 }
  0x18   : > { %p373_p2 = scmp.ne.s32.totalorder %s582_s28, %s372_s5  ;;  %p374_p3 = pneg %p586_p13 }
  0x19   : > { %s377_s8 = scalar_lea.hbm %s705_s0, 64  ;;  %p378_p5 = scmp.lt.s32.totalorder %s582_s28, %s705_s0 }
  0x1a   : > { %p375_p4 = pnand %p374_p3, %p373_p2  ;;  %p379_p8 = scmp.lt.s32.totalorder %s377_s8, %s372_s5 }
  0x1c   : > { %p376_p7 = pneg %p375_p4  ;;  %p380_p10 = por %p379_p8, %p378_p5 }
  0x1e   : > { %p381_p9 = pnand %p380_p10, %p376_p7 }
  0x20   : > { %384 = shalt.err (!%p381_p9)
}
  0x21   : > { %s385_s17 = scalar_lea.vmem %s590_s30, 32  ;;  %s498_s19 = smov [#allocation2]  }
  0x22   : > { %p386_p0 = scmp.ne.s32.totalorder %s590_s30, %s385_s17  ;;  %s390_s24 = sshll.u32 %s498_s19, 4  ;;  %s391_s24 = int_to_ptr.vmem [resolvable:$false] %s390_s24 }
  0x23   : > { %s392_s25 = scalar_lea.vmem %s391_s24, 64  ;;  %p393_p1 = scmp.lt.s32.totalorder %s590_s30, %s391_s24 }
  0x24   : > { %p388_p2 = pnand %p386_p0, %p374_p3  ;;  %p394_p12 = scmp.lt.s32.totalorder %s392_s25, %s385_s17 }
  0x26   : > { %p389_p4 = pneg %p388_p2  ;;  %p395_p11 = por %p394_p12, %p393_p1 }
  0x28   : > { %p396_p5 = pnand %p395_p11, %p389_p4 }
  0x2a   : > { %399 = shalt.err (!%p396_p5)
}
  0x2b   : > { %330 = dma.hbm_to_vmem [thread:$0]  (!%p586_p13), %s582_s28, 32, %s590_s30, %s118_s4  }
  0x2c   : > { %p715_p9 = scmp.lt.s32.totalorder %s496_s12, 3  ;;  %p716_p0 = scmp.ge.s32.totalorder %s496_s12, 1 }
  0x2d   : > { %s312_s27 = sshll.u32 %s496_s12, 4  ;;  %s138_s7 = scalar_lea.vmem [#allocation5], %s575_s23 }
  0x2e   : > { %p623_p7 = pnand %p716_p0, %p715_p9  ;;  %s631_s6 = scalar_lea.hbm %s706_s1, %s312_s27 }
  0x2f   : > { %s145_s8 = sshll.u32 %s138_s7, 4  ;;  %s136_s14 = scalar_lea.sflag [#allocation6], %s575_s23  ;;  %s146_s8 = int_to_ptr.vmem [resolvable:$true] %s145_s8 }
  0x30   : > { %s717_s26 = scalar_select %p623_p7, 1, 0 }
  0x31   : > { %s400_s28 = scalar_lea.hbm %s631_s6, 16  ;;  %s405_s16 = scalar_lea.hbm %s706_s1, 16384 }
  0x32   : > { %p401_p11 = scmp.ne.s32.totalorder %s631_s6, %s400_s28  ;;  %p406_p8 = scmp.lt.s32.totalorder %s631_s6, %s706_s1 }
  0x33   : > { %p407_p10 = scmp.lt.s32.totalorder %s405_s16, %s400_s28 }
  0x34   : > { %p403_p12 = pnand %p401_p11, %p374_p3 }
  0x35   : > { %p408_p2 = por %p407_p10, %p406_p8 }
  0x36   : > { %p404_p1 = pneg %p403_p12 }
  0x38   : > { %p409_p4 = pnand %p408_p2, %p404_p1 }
  0x3a   : > { %412 = shalt.err (!%p409_p4)
}
  0x3b   : > { %s413_s24 = scalar_lea.vmem %s146_s8, 16  ;;  %s499_s23 = smov [#allocation5]  }
  0x3c   : > { %p414_p5 = scmp.ne.s32.totalorder %s146_s8, %s413_s24  ;;  %s418_s25 = sshll.u32 %s499_s23, 4  ;;  %s419_s25 = int_to_ptr.vmem [resolvable:$false] %s418_s25 }
  0x3d   : > { %s420_s27 = scalar_lea.vmem %s419_s25, 32  ;;  %p421_p11 = scmp.lt.s32.totalorder %s146_s8, %s419_s25 }
  0x3e   : > { %p416_p9 = pnand %p414_p5, %p374_p3  ;;  %p422_p12 = scmp.lt.s32.totalorder %s420_s27, %s413_s24 }
  0x40   : > { %p417_p0 = pneg %p416_p9  ;;  %p423_p6 = por %p422_p12, %p421_p11 }
  0x42   : > { %p424_p7 = pnand %p423_p6, %p417_p0 }
  0x44   : > { %427 = shalt.err (!%p424_p7)
}
  0x45   : > { %333 = dma.hbm_to_vmem [thread:$0]  (!%p586_p13), %s631_s6, 16, %s146_s8, %s136_s14  }
  0x46   : > { %p718_p1 = scmp.ne.s32.totalorder %s717_s26, 0 }
  0x47   : > { %s656_s29 = sand.u32 (!%p718_p1), 1, %s488_s10   ;;  %p719_p3 = scmp.ne.s32.totalorder (!%p718_p1), %s711_s20, 0 }
  0x48   : > { %154 = sbr.rel (%p718_p1) target bundleno = 105 (0x69), region = 28  ;;  %s314_s5 = sshll.u32 (!%p718_p1), %s656_s29, 1 }
  0x49   : > { %s157_s7 = scalar_lea.sflag (!%p718_p1), [#allocation3], %s656_s29  ;;  %s160_s28 = scalar_lea.vmem (!%p718_p1), [#allocation2], %s314_s5 }
  0x4d   : > { %471 = dma.done.wait (%p719_p3), %s157_s7, 32  }
  0x4e   : > { %473 = vsyncadd (%p719_p3), %s157_s7, 4294967264  ;;  %s166_s3 = scalar_lea.sflag [#allocation6], %s656_s29  ;;  %s168_s26 = scalar_lea.vmem [#allocation5], %s656_s29 }
  0x4f   : > { %475 = dma.done.wait (%p719_p3), %s166_s3, 16  }
  0x50   : > { %477 = vsyncadd (%p719_p3), %s166_s3, 4294967280  ;;  %s192_s6 = scalar_lea.vmem [#allocation7], %s314_s5  ;;  %s318_s14 = sshll.u32 %s537_s13, 5  ;;  %v193_v0 = vld [vmem:[%s160_s28] sm:$0x3] }
  0x51   : > { %s217_s8 = sshll.u32 %s192_s6, 4  ;;  %v316_v1 = vld [vmem:[%s168_s26] ss:$0 sm:$0xff]  ;;  %s215_s16 = scalar_lea.hbm %s707_s2, %s318_s14  ;;  %s218_s8 = int_to_ptr.vmem [resolvable:$true] %s217_s8 }
  0x52   : > { %v201_v2 = vadd.f32 %v316_v1, %v193_v0  ;;  %s204_s17 = scalar_lea.sflag [#allocation4], %s656_s29  ;;  %s428_s19 = scalar_lea.vmem %s218_s8, 32 }
  0x53   : > { %p429_p6 = scmp.ne.s32.totalorder %s218_s8, %s428_s19  ;;  %p720_p13 = scmp.ne.s32.totalorder %s712_s21, 0 }
  0x54   : > { %202 = vst [vmem:[%s192_s6] sm:$0x3] %v201_v2  ;;  %s500_s20 = smov [#allocation7]  }
  0x55   : > { %p430_p7 = pnand %p429_p6, %p720_p13  ;;  %s432_s24 = sshll.u32 %s500_s20, 4  ;;  %s433_s24 = int_to_ptr.vmem [resolvable:$false] %s432_s24 }
  0x56   : > { %s434_s23 = scalar_lea.vmem %s433_s24, 64  ;;  %p435_p10 = scmp.lt.s32.totalorder %s218_s8, %s433_s24 }
  0x57   : > { %p431_p8 = pneg %p430_p7  ;;  %p436_p2 = scmp.lt.s32.totalorder %s434_s23, %s428_s19 }
  0x59   : > { %p437_p4 = por %p436_p2, %p435_p10 }
  0x5b   : > { %p438_p5 = pnand %p437_p4, %p431_p8 }
  0x5d   : > { %441 = shalt.err (!%p438_p5)
}
  0x5e   : > { %s442_s13 = scalar_lea.hbm %s215_s16, 32  ;;  %s446_s29 = scalar_lea.hbm %s707_s2, 64 }
  0x5f   : > { %p443_p9 = scmp.ne.s32.totalorder %s215_s16, %s442_s13  ;;  %p447_p12 = scmp.lt.s32.totalorder %s215_s16, %s707_s2 }
  0x60   : > { %p448_p1 = scmp.lt.s32.totalorder %s446_s29, %s442_s13 }
  0x61   : > { %p444_p0 = pnand %p443_p9, %p720_p13 }
  0x62   : > { %p449_p3 = por %p448_p1, %p447_p12 }
  0x63   : > { %p445_p11 = pneg %p444_p0 }
  0x65   : > { %p450_p6 = pnand %p449_p3, %p445_p11 }
  0x67   : > { %453 = shalt.err (!%p450_p6)
}
  0x68   : > { %325 = dma.vmem_to_hbm [thread:$0]  (%p720_p13), %s218_s8, 32, %s215_s16, %s204_s17  }
  0x69 PF: > { %s229_s28 = sand.u32 1, %s484_s9   ;;  %p721_p7 = scmp.ne.s32.totalorder %s713_s22, 0 }
  0x6a   : > { %p722_p8 = scmp.ge.s32.totalorder %s496_s12, 2  ;;  %s230_s3 = scalar_lea.sflag [#allocation4], %s229_s28 }
  0x6c   : > { %p335_p10 = pnand %p722_p8, %p721_p7 }
  0x6e   : > { %p336_p2 = pneg %p335_p10 }
  0x70   : > { %479 = dma.done.wait (%p336_p2), %s230_s3, 32  }
  0x71   : > { %481 = vsyncadd (%p336_p2), %s230_s3, 4294967264  ;;  %p18_p4 = scmp.ge.s32.totalorder %s541_s15, 4   ;;  %s723_s9 = smov %s488_s10 }
  0x72   : > { %s724_s10 = smov %s492_s11  ;;  %s725_s11 = smov %s553_s18 }
  0x73   : > { %s726_s12 = smov %s541_s15  ;;  %20 = sbr.rel (!%p18_p4) target bundleno = 7 (0x7), region = 86 }
  0x78   :  { %235 = vsyncpa [#allocation3], 1 }
  0x79   :  { %237 = vsyncpa [#allocation3 + $0x1], 1 }
  0x7a   :  { %238 = vsyncpa [#allocation6], 1 }
  0x7b   :  { %240 = vsyncpa [#allocation6 + $0x1], 1 }
  0x7c   :  { %241 = vsyncpa [#allocation4], 1 }
  0x7d   :  { %243 = vsyncpa [#allocation4 + $0x1], 1 }

</bundles_post_ra>
